<compile_context>
chip_gen: v7x
topology: tpu7x:2x2x1
jax: 0.10.0
libtpu: 0.0.40
codegen_flags: <defaults>
</compile_context>

<pallas_src>
import math
import functools

import jax
import jax.numpy as jnp
from jax import lax
from jax.experimental import pallas as pl
from jax.experimental.pallas import tpu as pltpu


def _mhsa_encoder_kernel(x_ref, wqkv_ref, bqkv_ref, o_ref, *,
                         num_layers, num_heads, head_dim, seq):
    """One batch element per grid step; all encoder layers fused.

    x_ref:    (S, H)            activations for this batch element
    wqkv_ref: (L, 3*nh, H, hd)  per-(layer, qkv, head) projection weights (bf16);
                                group order g = qkv_idx*nh + h; 1/sqrt(hd) folded into Wq
    bqkv_ref: (L, 3*nh, 1, hd)  matching biases (f32); 1/sqrt(hd) folded into bq
    o_ref:    (S, H)            output activations
    """
    hidden = num_heads * head_dim
    groups = 3 * num_heads

    act = x_ref[...].astype(jnp.float32)                     # (S, H)

    for layer in range(num_layers):                           # static unroll: L is small
        w = wqkv_ref[layer]                                   # (3nh, H, hd) bf16
        bias = bqkv_ref[layer]                                # (3nh, 1, hd) f32

        # Fused, head-batched Q/K/V projection:
        #   (3nh, S, H) @ (3nh, H, hd) -> (3nh, S, hd), already in grouped layout.
        act_b = jnp.broadcast_to(act.astype(jnp.bfloat16), (groups, seq, hidden))
        qkv_g = lax.dot_general(act_b, w, (((2,), (1,)), ((0,), (0,))),
                                preferred_element_type=jnp.float32)
        qkv_g = qkv_g + bias                                  # (3nh, S, hd), f32

        q_g = qkv_g[0 * num_heads:1 * num_heads]              # (nh, S, hd), scale folded in
        k_g = qkv_g[1 * num_heads:2 * num_heads]              # (nh, S, hd)
        v_g = qkv_g[2 * num_heads:3 * num_heads]              # (nh, S, hd)

        # scores[h, i, j] = sum_d q[h, i, d] * k[h, j, d]   (scale already in Wq/bq)
        scores = lax.dot_general(q_g.astype(jnp.bfloat16), k_g.astype(jnp.bfloat16),
                                 (((2,), (2,)), ((0,), (0,))),
                                 preferred_element_type=jnp.float32)   # (nh, S, S)
        # (+ zero attention mask -> identity, skipped)

        # Softmax over keys (max-subtracted, exact division), kept in f32.
        scores = scores - jnp.max(scores, axis=-1, keepdims=True)
        p = jnp.exp(scores)
        p = p / jnp.sum(p, axis=-1, keepdims=True)

        # context[h, i, d] = sum_j p[h, i, j] * v[h, j, d]
        ctx = lax.dot_general(p.astype(jnp.bfloat16), v_g.astype(jnp.bfloat16),
                              (((2,), (1,)), ((0,), (0,))),
                              preferred_element_type=jnp.float32)      # (nh, S, hd)

        # Merge heads back into lanes: nh pieces of (S, hd) -> (S, H).
        merged = jnp.concatenate([ctx[h] for h in range(num_heads)], axis=-1)
        act = jnp.tanh(merged)

    o_ref[...] = act.astype(o_ref.dtype)


def fuse_params(params, *, num_heads):
    """One-time parameter preparation (hoisted out of the per-call wrapper).

    params: list over layers of (wq, bq, wk, bk, wv, bv); weights (H, H) pre-transposed
            so y = x @ W + b; biases (1, H).
    Returns:
      wqkv: (L, 3*nh, H, hd) bfloat16, group g = qkv_idx*nh + h, with 1/sqrt(hd)
            folded into the Q weights.
      bqkv: (L, 3*nh, 1, hd) float32, with 1/sqrt(hd) folded into the Q biases.
    """
    H = params[0][0].shape[0]
    hd = H // num_heads
    scale = 1.0 / math.sqrt(hd)

    def split_w(w):   # (H_in, H_out) -> (nh, H_in, hd); output column h*hd + d
        return w.reshape(H, num_heads, hd).transpose(1, 0, 2)

    def split_b(b):   # (1, H) -> (nh, 1, hd)
        return b.reshape(num_heads, 1, hd)

    wqkv, bqkv = [], []
    for (wq, bq, wk, bk, wv, bv) in params:
        wqkv.append(jnp.concatenate(
            [split_w(wq * scale), split_w(wk), split_w(wv)], axis=0))     # (3nh, H, hd)
        bqkv.append(jnp.concatenate(
            [split_b(bq * scale), split_b(bk), split_b(bv)], axis=0))     # (3nh, 1, hd)

    wqkv = jnp.stack(wqkv, axis=0).astype(jnp.bfloat16)                   # (L, 3nh, H, hd)
    bqkv = jnp.stack(bqkv, axis=0).astype(jnp.float32)                    # (L, 3nh, 1, hd)
    return wqkv, bqkv


def multi_head_self_attention(x, wqkv, bqkv, *, num_heads):
    """Encoder forward: x (B, S, H) -> (B, S, H), one pallas_call, grid over batch."""
    B, S, H = x.shape
    hd = H // num_heads
    L = wqkv.shape[0]

    x2 = x.reshape(B * S, H)
    kernel = functools.partial(_mhsa_encoder_kernel, num_layers=L,
                               num_heads=num_heads, head_dim=hd, seq=S)

    out2 = pl.pallas_call(
        kernel,
        out_shape=jax.ShapeDtypeStruct((B * S, H), x.dtype),
        grid_spec=pltpu.PrefetchScalarGridSpec(
            num_scalar_prefetch=0,
            grid=(B,),   # batch elements are independent -> both TCs on v7x megacore
            in_specs=[pl.BlockSpec((S, H), lambda b: (b, 0)),
                      pl.BlockSpec((L, 3 * num_heads, H, hd), lambda b: (0, 0, 0, 0)),
                      pl.BlockSpec((L, 3 * num_heads, 1, hd), lambda b: (0, 0, 0, 0))],
            out_specs=pl.BlockSpec((S, H), lambda b: (b, 0)),
        ),
        compiler_params=pltpu.CompilerParams(
            dimension_semantics=("parallel",)),
    )(x2, wqkv, bqkv)

    return out2.reshape(B, S, H)


def _reference(x, params, *, num_heads):
    """Pure-JAX float32 reference of the same forward pass (for correctness check)."""
    B, S, H = x.shape
    hd = H // num_heads
    for (wq, bq, wk, bk, wv, bv) in params:
        q = x @ wq + bq
        k = x @ wk + bk
        v = x @ wv + bv

        def split(t):
            return t.reshape(B, S, num_heads, hd).transpose(0, 2, 1, 3)

        qh, kh, vh = split(q), split(k), split(v)
        scores = jnp.einsum('bhqd,bhkd->bhqk', qh, kh) / math.sqrt(hd)
        p = jax.nn.softmax(scores, axis=-1)
        ctx = jnp.einsum('bhqk,bhkd->bhqd', p, vh)
        ctx = ctx.transpose(0, 2, 1, 3).reshape(B, S, H)
        x = jnp.tanh(ctx)
    return x


def init_params(key, hidden_dim, num_layers):
    """Deterministic synthetic parameters (Q/K/V Linear per layer)."""
    params = []
    scale = 1.0 / math.sqrt(hidden_dim)
    for _ in range(num_layers):
        layer = []
        for _ in range(3):  # q, k, v
            key, kw, kb = jax.random.split(key, 3)
            w = jax.random.uniform(kw, (hidden_dim, hidden_dim),
                                   jnp.float32, -scale, scale)
            b = jax.random.uniform(kb, (1, hidden_dim),
                                   jnp.float32, -scale, scale)
            layer += [w, b]
        params.append(tuple(layer))
    return params


if __name__ == "__main__":
    # Small config consistent with the module:
    #   config.hidden_dim (= bert_config.hidden_size) = 32
    #   bert_config.num_attention_heads = 4, config.num_mhsa_layer = 2
    B, S, H = 2, 8, 32
    NUM_HEADS = 4
    NUM_LAYERS = 2

    key = jax.random.PRNGKey(0)
    key, kx = jax.random.split(key)
    x = jax.random.normal(kx, (B, S, H), dtype=jnp.float32)

    params = init_params(key, H, NUM_LAYERS)
    wqkv, bqkv = fuse_params(params, num_heads=NUM_HEADS)   # one-time, not per forward

    out = multi_head_self_attention(x, wqkv, bqkv, num_heads=NUM_HEADS)
    out = jax.block_until_ready(out)

    assert out.shape == (B, S, H) and out.dtype == jnp.float32
    assert bool(jnp.all(jnp.isfinite(out)))

    # Correctness vs. pure-f32 reference. bf16 MXU operands (requested perf change)
    # give ~1e-2-scale deviations on the tanh-bounded outputs across 2 layers.
    ref = _reference(x, params, num_heads=NUM_HEADS)
    assert bool(jnp.allclose(out, ref, atol=5e-2, rtol=0.0))

    print("KERNEL_OK")
</pallas_src>

<mosaic_0001>
module attributes {stable_mosaic.version = 11 : i64} {
  func.func @_mhsa_encoder_kernel(%arg0: i32, %arg1: memref<8x32xf32, #tpu.memory_space<vmem>>, %arg2: memref<2x12x32x8xbf16, #tpu.memory_space<vmem>>, %arg3: memref<2x12x1x8xf32, #tpu.memory_space<vmem>>, %arg4: memref<8x32xf32, #tpu.memory_space<vmem>>) attributes {dimension_semantics = [#tpu.dimension_semantics<parallel>], iteration_bounds = array<i64: 2>, scalar_prefetch = 0 : i64, scratch_operands = 0 : i64, tpu.core_type = #tpu.core_type<tc>, window_params = [{transform_indices = @transform_0, window_bounds = array<i64: 8, 32>}, {pipeline_mode = #tpu.pipeline_mode<synchronous>, transform_indices = @transform_1, window_bounds = array<i64: 2, 12, 32, 8>}, {pipeline_mode = #tpu.pipeline_mode<synchronous>, transform_indices = @transform_2, window_bounds = array<i64: 2, 12, 1, 8>}, {transform_indices = @transform_3, window_bounds = array<i64: 8, 32>}]} {
    %c0 = arith.constant 0 : index
    %c0_0 = arith.constant 0 : index
    %0 = vector.load %arg1[%c0, %c0_0] : memref<8x32xf32, #tpu.memory_space<vmem>>, vector<8x32xf32>
    %c0_1 = arith.constant 0 : index
    %c0_2 = arith.constant 0 : index
    %c0_3 = arith.constant 0 : index
    %c0_4 = arith.constant 0 : index
    %1 = vector.load %arg2[%c0_1, %c0_2, %c0_3, %c0_4] : memref<2x12x32x8xbf16, #tpu.memory_space<vmem>>, vector<1x12x32x8xbf16>
    %2 = vector.shape_cast %1 : vector<1x12x32x8xbf16> to vector<12x32x8xbf16>
    %c0_5 = arith.constant 0 : index
    %c0_6 = arith.constant 0 : index
    %c0_7 = arith.constant 0 : index
    %c0_8 = arith.constant 0 : index
    %3 = vector.load %arg3[%c0_5, %c0_6, %c0_7, %c0_8] : memref<2x12x1x8xf32, #tpu.memory_space<vmem>>, vector<1x12x1x8xf32>
    %4 = vector.shape_cast %3 : vector<1x12x1x8xf32> to vector<12x1x8xf32>
    %5 = arith.truncf %0 : vector<8x32xf32> to vector<8x32xbf16>
    %6 = vector.shape_cast %5 : vector<8x32xbf16> to vector<1x8x32xbf16>
    %7 = vector.broadcast %6 : vector<1x8x32xbf16> to vector<12x8x32xbf16>
    %cst = arith.constant dense<0.000000e+00> : vector<12x8x8xf32>
    %8 = tpu.matmul %7, %2, %cst {dimension_numbers = #tpu.dot_dimension_numbers<[2], [1], [1], [2], [0, 0, 0, 1, 1, 2], [0], [0]>} : vector<12x8x32xbf16>, vector<12x32x8xbf16>, vector<12x8x8xf32> -> vector<12x8x8xf32>
    %9 = vector.broadcast %4 : vector<12x1x8xf32> to vector<12x8x8xf32>
    %10 = arith.addf %8, %9 : vector<12x8x8xf32>
    %11 = vector.extract_strided_slice %10 {offsets = [0, 0, 0], sizes = [4, 8, 8], strides = [1, 1, 1]} : vector<12x8x8xf32> to vector<4x8x8xf32>
    %12 = vector.extract_strided_slice %10 {offsets = [4, 0, 0], sizes = [4, 8, 8], strides = [1, 1, 1]} : vector<12x8x8xf32> to vector<4x8x8xf32>
    %13 = vector.extract_strided_slice %10 {offsets = [8, 0, 0], sizes = [4, 8, 8], strides = [1, 1, 1]} : vector<12x8x8xf32> to vector<4x8x8xf32>
    %14 = arith.truncf %11 : vector<4x8x8xf32> to vector<4x8x8xbf16>
    %15 = arith.truncf %12 : vector<4x8x8xf32> to vector<4x8x8xbf16>
    %cst_9 = arith.constant dense<0.000000e+00> : vector<4x8x8xf32>
    %16 = tpu.matmul %14, %15, %cst_9 {dimension_numbers = #tpu.dot_dimension_numbers<[2], [2], [1], [1], [0, 0, 0, 1, 1, 1], [0], [0]>} : vector<4x8x8xbf16>, vector<4x8x8xbf16>, vector<4x8x8xf32> -> vector<4x8x8xf32>
    %cst_10 = arith.constant dense<0xFF800000> : vector<4x8xf32>
    %17 = vector.multi_reduction <maximumf>, %16, %cst_10 [2] : vector<4x8x8xf32> to vector<4x8xf32>
    %18 = vector.shape_cast %17 : vector<4x8xf32> to vector<4x8x1xf32>
    %19 = vector.broadcast %18 : vector<4x8x1xf32> to vector<4x8x8xf32>
    %20 = arith.subf %16, %19 : vector<4x8x8xf32>
    %21 = math.exp %20 : vector<4x8x8xf32>
    %cst_11 = arith.constant dense<0.000000e+00> : vector<4x8xf32>
    %22 = vector.multi_reduction <add>, %21, %cst_11 [2] : vector<4x8x8xf32> to vector<4x8xf32>
    %23 = vector.shape_cast %22 : vector<4x8xf32> to vector<4x8x1xf32>
    %24 = vector.broadcast %23 : vector<4x8x1xf32> to vector<4x8x8xf32>
    %25 = arith.divf %21, %24 : vector<4x8x8xf32>
    %26 = arith.truncf %25 : vector<4x8x8xf32> to vector<4x8x8xbf16>
    %27 = arith.truncf %13 : vector<4x8x8xf32> to vector<4x8x8xbf16>
    %cst_12 = arith.constant dense<0.000000e+00> : vector<4x8x8xf32>
    %28 = tpu.matmul %26, %27, %cst_12 {dimension_numbers = #tpu.dot_dimension_numbers<[2], [1], [1], [2], [0, 0, 0, 1, 1, 2], [0], [0]>} : vector<4x8x8xbf16>, vector<4x8x8xbf16>, vector<4x8x8xf32> -> vector<4x8x8xf32>
    %29 = vector.extract_strided_slice %28 {offsets = [0, 0, 0], sizes = [1, 8, 8], strides = [1, 1, 1]} : vector<4x8x8xf32> to vector<1x8x8xf32>
    %30 = vector.shape_cast %29 : vector<1x8x8xf32> to vector<8x8xf32>
    %31 = vector.extract_strided_slice %28 {offsets = [1, 0, 0], sizes = [1, 8, 8], strides = [1, 1, 1]} : vector<4x8x8xf32> to vector<1x8x8xf32>
    %32 = vector.shape_cast %31 : vector<1x8x8xf32> to vector<8x8xf32>
    %33 = vector.extract_strided_slice %28 {offsets = [2, 0, 0], sizes = [1, 8, 8], strides = [1, 1, 1]} : vector<4x8x8xf32> to vector<1x8x8xf32>
    %34 = vector.shape_cast %33 : vector<1x8x8xf32> to vector<8x8xf32>
    %35 = vector.extract_strided_slice %28 {offsets = [3, 0, 0], sizes = [1, 8, 8], strides = [1, 1, 1]} : vector<4x8x8xf32> to vector<1x8x8xf32>
    %36 = vector.shape_cast %35 : vector<1x8x8xf32> to vector<8x8xf32>
    %37 = tpu.concatenate %30, %32, %34, %36 in 1 : vector<8x8xf32>, vector<8x8xf32>, vector<8x8xf32>, vector<8x8xf32> -> vector<8x32xf32>
    %38 = math.tanh %37 : vector<8x32xf32>
    %c1 = arith.constant 1 : index
    %c0_13 = arith.constant 0 : index
    %c0_14 = arith.constant 0 : index
    %c0_15 = arith.constant 0 : index
    %39 = vector.load %arg2[%c1, %c0_13, %c0_14, %c0_15] : memref<2x12x32x8xbf16, #tpu.memory_space<vmem>>, vector<1x12x32x8xbf16>
    %40 = vector.shape_cast %39 : vector<1x12x32x8xbf16> to vector<12x32x8xbf16>
    %c1_16 = arith.constant 1 : index
    %c0_17 = arith.constant 0 : index
    %c0_18 = arith.constant 0 : index
    %c0_19 = arith.constant 0 : index
    %41 = vector.load %arg3[%c1_16, %c0_17, %c0_18, %c0_19] : memref<2x12x1x8xf32, #tpu.memory_space<vmem>>, vector<1x12x1x8xf32>
    %42 = vector.shape_cast %41 : vector<1x12x1x8xf32> to vector<12x1x8xf32>
    %43 = arith.truncf %38 : vector<8x32xf32> to vector<8x32xbf16>
    %44 = vector.shape_cast %43 : vector<8x32xbf16> to vector<1x8x32xbf16>
    %45 = vector.broadcast %44 : vector<1x8x32xbf16> to vector<12x8x32xbf16>
    %cst_20 = arith.constant dense<0.000000e+00> : vector<12x8x8xf32>
    %46 = tpu.matmul %45, %40, %cst_20 {dimension_numbers = #tpu.dot_dimension_numbers<[2], [1], [1], [2], [0, 0, 0, 1, 1, 2], [0], [0]>} : vector<12x8x32xbf16>, vector<12x32x8xbf16>, vector<12x8x8xf32> -> vector<12x8x8xf32>
    %47 = vector.broadcast %42 : vector<12x1x8xf32> to vector<12x8x8xf32>
    %48 = arith.addf %46, %47 : vector<12x8x8xf32>
    %49 = vector.extract_strided_slice %48 {offsets = [0, 0, 0], sizes = [4, 8, 8], strides = [1, 1, 1]} : vector<12x8x8xf32> to vector<4x8x8xf32>
    %50 = vector.extract_strided_slice %48 {offsets = [4, 0, 0], sizes = [4, 8, 8], strides = [1, 1, 1]} : vector<12x8x8xf32> to vector<4x8x8xf32>
    %51 = vector.extract_strided_slice %48 {offsets = [8, 0, 0], sizes = [4, 8, 8], strides = [1, 1, 1]} : vector<12x8x8xf32> to vector<4x8x8xf32>
    %52 = arith.truncf %49 : vector<4x8x8xf32> to vector<4x8x8xbf16>
    %53 = arith.truncf %50 : vector<4x8x8xf32> to vector<4x8x8xbf16>
    %cst_21 = arith.constant dense<0.000000e+00> : vector<4x8x8xf32>
    %54 = tpu.matmul %52, %53, %cst_21 {dimension_numbers = #tpu.dot_dimension_numbers<[2], [2], [1], [1], [0, 0, 0, 1, 1, 1], [0], [0]>} : vector<4x8x8xbf16>, vector<4x8x8xbf16>, vector<4x8x8xf32> -> vector<4x8x8xf32>
    %cst_22 = arith.constant dense<0xFF800000> : vector<4x8xf32>
    %55 = vector.multi_reduction <maximumf>, %54, %cst_22 [2] : vector<4x8x8xf32> to vector<4x8xf32>
    %56 = vector.shape_cast %55 : vector<4x8xf32> to vector<4x8x1xf32>
    %57 = vector.broadcast %56 : vector<4x8x1xf32> to vector<4x8x8xf32>
    %58 = arith.subf %54, %57 : vector<4x8x8xf32>
    %59 = math.exp %58 : vector<4x8x8xf32>
    %cst_23 = arith.constant dense<0.000000e+00> : vector<4x8xf32>
    %60 = vector.multi_reduction <add>, %59, %cst_23 [2] : vector<4x8x8xf32> to vector<4x8xf32>
    %61 = vector.shape_cast %60 : vector<4x8xf32> to vector<4x8x1xf32>
    %62 = vector.broadcast %61 : vector<4x8x1xf32> to vector<4x8x8xf32>
    %63 = arith.divf %59, %62 : vector<4x8x8xf32>
    %64 = arith.truncf %63 : vector<4x8x8xf32> to vector<4x8x8xbf16>
    %65 = arith.truncf %51 : vector<4x8x8xf32> to vector<4x8x8xbf16>
    %cst_24 = arith.constant dense<0.000000e+00> : vector<4x8x8xf32>
    %66 = tpu.matmul %64, %65, %cst_24 {dimension_numbers = #tpu.dot_dimension_numbers<[2], [1], [1], [2], [0, 0, 0, 1, 1, 2], [0], [0]>} : vector<4x8x8xbf16>, vector<4x8x8xbf16>, vector<4x8x8xf32> -> vector<4x8x8xf32>
    %67 = vector.extract_strided_slice %66 {offsets = [0, 0, 0], sizes = [1, 8, 8], strides = [1, 1, 1]} : vector<4x8x8xf32> to vector<1x8x8xf32>
    %68 = vector.shape_cast %67 : vector<1x8x8xf32> to vector<8x8xf32>
    %69 = vector.extract_strided_slice %66 {offsets = [1, 0, 0], sizes = [1, 8, 8], strides = [1, 1, 1]} : vector<4x8x8xf32> to vector<1x8x8xf32>
    %70 = vector.shape_cast %69 : vector<1x8x8xf32> to vector<8x8xf32>
    %71 = vector.extract_strided_slice %66 {offsets = [2, 0, 0], sizes = [1, 8, 8], strides = [1, 1, 1]} : vector<4x8x8xf32> to vector<1x8x8xf32>
    %72 = vector.shape_cast %71 : vector<1x8x8xf32> to vector<8x8xf32>
    %73 = vector.extract_strided_slice %66 {offsets = [3, 0, 0], sizes = [1, 8, 8], strides = [1, 1, 1]} : vector<4x8x8xf32> to vector<1x8x8xf32>
    %74 = vector.shape_cast %73 : vector<1x8x8xf32> to vector<8x8xf32>
    %75 = tpu.concatenate %68, %70, %72, %74 in 1 : vector<8x8xf32>, vector<8x8xf32>, vector<8x8xf32>, vector<8x8xf32> -> vector<8x32xf32>
    %76 = math.tanh %75 : vector<8x32xf32>
    %c0_25 = arith.constant 0 : index
    %c0_26 = arith.constant 0 : index
    %77 = vector.load %arg4[%c0_25, %c0_26] : memref<8x32xf32, #tpu.memory_space<vmem>>, vector<8x32xf32>
    tpu.vector_store %arg4[%c0_25, %c0_26], %76 {strides = array<i32>} : memref<8x32xf32, #tpu.memory_space<vmem>>, vector<8x32xf32>,
    return
  }
  func.func @transform_0(%arg0: i32) -> (i32, i32) {
    %c0_i32 = arith.constant 0 : i32
    %c0_i32_0 = arith.constant 0 : i32
    return %arg0, %c0_i32 : i32, i32
  }
  func.func @transform_1(%arg0: i32) -> (i32, i32, i32, i32) {
    %c0_i32 = arith.constant 0 : i32
    %c0_i32_0 = arith.constant 0 : i32
    %c0_i32_1 = arith.constant 0 : i32
    %c0_i32_2 = arith.constant 0 : i32
    %c0_i32_3 = arith.constant 0 : i32
    return %c0_i32, %c0_i32_0, %c0_i32_1, %c0_i32_2 : i32, i32, i32, i32
  }
  func.func @transform_2(%arg0: i32) -> (i32, i32, i32, i32) {
    %c0_i32 = arith.constant 0 : i32
    %c0_i32_0 = arith.constant 0 : i32
    %c0_i32_1 = arith.constant 0 : i32
    %c0_i32_2 = arith.constant 0 : i32
    %c0_i32_3 = arith.constant 0 : i32
    return %c0_i32, %c0_i32_0, %c0_i32_1, %c0_i32_2 : i32, i32, i32, i32
  }
  func.func @transform_3(%arg0: i32) -> (i32, i32) {
    %c0_i32 = arith.constant 0 : i32
    %c0_i32_0 = arith.constant 0 : i32
    return %arg0, %c0_i32 : i32, i32
  }
}

</mosaic_0001>

<bundles_post_ra>
// kernel: tpu_custom_call.1
= control target key start
LH: loop header
LB: loop body
LE: loop exit
PB: predicated region body
PF: predicated region fallthrough
CT: control target
= control target key end

     0   :  { %8 = vsyncpa [#allocation3], 0  ;;  %s4034_s0 = inlined_call_operand.vmem [shape: f32[16,32], index: 0, kind: input, shape index: {}]   ;;  %s4035_s1 = inlined_call_operand.vmem [shape: bf16[2,12,32,8], index: 1, kind: input, shape index: {}]   ;;  %s4036_s2 = inlined_call_operand.vmem [shape: f32[2,12,1,8], index: 2, kind: input, shape index: {}]   ;;  %s4037_s3 = inlined_call_operand.hbm [shape: f32[16,32], index: 3, kind: output, shape index: {}]  }
   0x1   :  { %10 = vsyncpa [#allocation3 + $0x1], 0  ;;  %s3449_s12 = smov 0   ;;  %s3451_s13 = smov 0  }
   0x2   :  { %s3453_s14 = smov 0   ;;  %s3455_s15 = smov 0  }
   0x3 LB: > { %s3470_s16 = sadd.s32 4294967295, %s3421_s15   ;;  %s2657_s17 = sadd.s32 4294967294, %s3421_s15   ;;  %s3421_s15 = sphi %s3455_s15, %s4043_s15   ;;  %s3417_s14 = sphi %s3453_s14, %s4042_s14   ;;  %s3413_s13 = sphi %s3451_s13, %s4041_s13   ;;  %s3409_s12 = sphi %s3449_s12, %s4040_s12  }
   0x4   : > { %s3474_s18 = sadd.s32 1, %s3421_s15   ;;  %s91_s19 = sadd.s32 1, %s3417_s14 }
   0x5   : > { %s88_s20 = ssub.s32 %s3421_s15, %s3474_s18  ;;  %p101_p0 = scmp.ne.s32.totalorder %s3417_s14, %s3413_s13 }
   0x6   : > { %p89_p1 = scmp.eq.s32.totalorder %s88_s20, 0  ;;  %p102_p2 = scmp.eq.s32.totalorder %s3470_s16, 1 }
   0x7   : > { %p107_p3 = scmp.ne.s32.totalorder %s3413_s13, %s3409_s12  ;;  %p108_p4 = scmp.eq.s32.totalorder %s2657_s17, 1 }
   0x8   : > { %s3485_s21 = scalar_select %p89_p1, %s3417_s14, %s91_s19  }
   0x9   : > { %p3487_p5 = por %p102_p2, %p101_p0  ;;  %p3491_p6 = por %p108_p4, %p107_p3 }
   0xa   : > { %p2660_p7 = scmp.ge.s32.totalorder %s3421_s15, 1  ;;  %p139_p8 = scmp.lt.s32.totalorder %s3421_s15, 3 }
   0xc   : > { %p140_p9 = pnand %p2660_p7, %p139_p8 }
   0xd   : > { %v3275_v0 = vld [vmem:[%s4035_s1] sm:$0xff] (!%p140_p9)   ;;  %v3423_v1 = vmov (!%p140_p9), 0.0   ;;  %v3276_v2 = vld [vmem:[%s4035_s1 + $0x10] sm:$0xff] (!%p140_p9)   ;;  %v3277_v3 = vld [vmem:[%s4035_s1 + $0x8] sm:$0xff] (!%p140_p9)   ;;  %vm3424_vm0 = vmmov (!%p140_p9), 0   ;;  %p162_p10 = scmp.lt.s32.totalorder (!%p140_p9), %s3470_s16, 1 }
   0xe   : > { %143 = sbr.rel (%p140_p9) target bundleno = 2282 (0x8ea), region = 32  ;;  %2943 = vmatprep.subr.bf16.mxu0 (!%p140_p9), %v3423_v1  ;;  %2951 = vmatprep.subr.bf16.mxu1 (!%p140_p9), %v3423_v1  ;;  %v3278_v4 = vld [vmem:[%s4035_s1 + $0x18] sm:$0xff] (!%p140_p9)   ;;  %v3279_v5 = vld [vmem:[%s4035_s1 + $0x20] sm:$0xff] (!%p140_p9)   ;;  %v3280_v6 = vld [vmem:[%s4035_s1 + $0x30] sm:$0xff] (!%p140_p9)   ;;  %vm313_vm1 = vcmask (!%p140_p9), 261120   ;;  %vm937_vm2 = vcmask (!%p140_p9), 64512  }
   0xf   : > { %2944 = vmatpush3.bf16.msra.mxu0 (!%p140_p9), %v3275_v0  ;;  %2947 = vmatprep.mubr.msk.bf16.mxu0 (!%p140_p9), %vm3424_vm0, %v3423_v1  ;;  %v3281_v9 = vld [vmem:[%s4035_s1 + $0x28] sm:$0xff] (!%p140_p9)   ;;  %v3282_v10 = vld [vmem:[%s4035_s1 + $0x38] sm:$0xff] (!%p140_p9)   ;;  %v3283_v11 = vld [vmem:[%s4035_s1 + $0x40] sm:$0xff] (!%p140_p9)   ;;  %vm1177_vm3 = vcmask (!%p140_p9), 1043456   ;;  %s3425_s29 = smov (!%p140_p9), 8   ;;  %s3426_s7 = smov (!%p140_p9), 16  }
  0x10   : > { %2952 = vmatpush3.bf16.msra.mxu1 (!%p140_p9), %v3276_v2  ;;  %2945 = vmatprep.subr.bf16.mxu0 (!%p140_p9), %v3423_v1  ;;  %v3284_v12 = vld [vmem:[%s4035_s1 + $0x50] sm:$0xff] (!%p140_p9)   ;;  %v3285_v13 = vld [vmem:[%s4035_s1 + $0x48] sm:$0xff] (!%p140_p9)   ;;  %v3286_v14 = vld [vmem:[%s4035_s1 + $0x58] sm:$0xff] (!%p140_p9)   ;;  %s3427_s17 = smov (!%p140_p9), 24   ;;  %vm1372_vm4 = vcmask (!%p140_p9), 130048   ;;  %vm1374_vm5 = vcmask (!%p140_p9), 195584  }
  0x11   : > { %2953 = vmatprep.subr.bf16.mxu1 (!%p140_p9), %v3423_v1  ;;  %2955 = vmatprep.mubr.msk.bf16.mxu1 (!%p140_p9), %vm3424_vm0, %v3423_v1  ;;  %v3287_v15 = vld [vmem:[%s4035_s1 + $0x60] sm:$0xff] (!%p140_p9)   ;;  %v3288_v16 = vld [vmem:[%s4035_s1 + $0x70] sm:$0xff] (!%p140_p9)   ;;  %v3289_v17 = vld [vmem:[%s4035_s1 + $0x68] sm:$0xff] (!%p140_p9)   ;;  %s2836_s26 = sshll.u32 (!%p140_p9), %s3470_s16, 7 }
  0x12   : > { %v3290_v18 = vld [vmem:[%s4035_s1 + $0x78] sm:$0xff] (!%p140_p9)   ;;  %v3291_v19 = vld [vmem:[%s4035_s1 + $0x80] sm:$0xff] (!%p140_p9)   ;;  %v3292_v20 = vld [vmem:[%s4035_s1 + $0x90] sm:$0xff] (!%p140_p9)   ;;  %s3991_s4 = scalar_lea.hbm (!%p140_p9), %s4037_s3, %s2836_s26 }
  0x13   : > { %2946 = vmatpush3.bf16.msra.mxu0 (!%p140_p9), %v3277_v3  ;;  %v3293_v21 = vld [vmem:[%s4035_s1 + $0x88] sm:$0xff] (!%p140_p9)   ;;  %v3294_v22 = vld [vmem:[%s4035_s1 + $0x98] sm:$0xff] (!%p140_p9)   ;;  %v3295_v23 = vld [vmem:[%s4035_s1 + $0xa0] sm:$0xff] (!%p140_p9)  }
  0x14   : > { %2954 = vmatpush3.bf16.msra.mxu1 (!%p140_p9), %v3278_v4  ;;  %2959 = vmatprep.subr.bf16.mxu0 (!%p140_p9), %v3423_v1  ;;  %v3296_v24 = vld [vmem:[%s4035_s1 + $0xb0] sm:$0xff] (!%p140_p9)   ;;  %v3297_v25 = vld [vmem:[%s4035_s1 + $0xa8] sm:$0xff] (!%p140_p9)   ;;  %v3298_v26 = vld [vmem:[%s4035_s1 + $0xb8] sm:$0xff] (!%p140_p9)  }
  0x15   : > { %s163_s5 = scalar_select %p162_p10, %s3470_s16, 1  ;;  %2967 = vmatprep.subr.bf16.mxu1 %v3423_v1  ;;  %v2667_v43 = vld [vmem:[%s4036_s2 + $0x4] ss:$0 sm:$0xff]  ;;  %v2668_v44 = vld [vmem:[%s4036_s2 + $0x5] ss:$0 sm:$0xff] }
  0x16   : > { %v2663_v57 = vld [vmem:[%s4036_s2] ss:$0 sm:$0xff]  ;;  %v2664_v58 = vld [vmem:[%s4036_s2 + $0x1] ss:$0 sm:$0xff]  ;;  %v2669_v61 = vld [vmem:[%s4036_s2 + $0x6] ss:$0 sm:$0xff] }
  0x17   : > { %s2662_s6 = sshll.u32 %s163_s5, 3  ;;  %v2670_v62 = vld [vmem:[%s4036_s2 + $0x7] ss:$0 sm:$0xff]  ;;  %s3428_s16 = smov [#allocation2]  }
  0x18   : > { %s165_s11 = scalar_lea.vmem %s4034_s0, %s2662_s6  ;;  %s3363_s8 = sshll.u32 %s3428_s16, 4  ;;  %s3364_s8 = int_to_ptr.vmem [resolvable:$false] %s3363_s8 }
  0x19   : > { %v167_v7 = vld [vmem:[%s165_s11] sm:$0xff]  ;;  %s3365_s9 = scalar_lea.vmem %s3364_s8, 256 }
  0x1a   : > { %v3530_v8 = vpack.c.bf16 %v167_v7, %v167_v7 }
  0x1c   : > { %2948 = vmatmul.mubr.msk.bf16.vlgmr.msra.gmra.mrb[0].mxu0 %vm313_vm1, %v3530_v8  ;;  %2956 = vmatmul.mubr.msk.bf16.vlgmr.msra.gmra.mrb[0].mxu1 %vm313_vm1, %v3530_v8 }
  0x1d   : > { %2960 = vmatpush3.bf16.msra.mxu0 %v3279_v5  ;;  %2968 = vmatpush3.bf16.msra.mxu1 %v3280_v6 }
  0x1e   : > { %2961 = vmatprep.subr.bf16.mxu0 %v3423_v1  ;;  %2969 = vmatprep.subr.bf16.mxu1 %v3423_v1 }
  0x1f   : > { %2963 = vmatprep.mubr.msk.bf16.mxu0 %vm3424_vm0, %v3423_v1  ;;  %2971 = vmatprep.mubr.msk.bf16.mxu1 %vm3424_vm0, %v3423_v1 }
  0x21   : > { %2962 = vmatpush3.bf16.msra.mxu0 %v3281_v9  ;;  %2970 = vmatpush3.bf16.msra.mxu1 %v3282_v10 }
  0x22   : > { %2975 = vmatprep.subr.bf16.mxu0 %v3423_v1  ;;  %2983 = vmatprep.subr.bf16.mxu1 %v3423_v1 }
  0x24   : > { %2964 = vmatmul.mubr.msk.bf16.vlgmr.msra.gmra.mrb[4].mxu0 %vm313_vm1, %v3530_v8  ;;  %2972 = vmatmul.mubr.msk.bf16.vlgmr.msra.gmra.mrb[4].mxu1 %vm313_vm1, %v3530_v8 }
  0x25   : > { %2976 = vmatpush3.bf16.msra.mxu0 %v3283_v11  ;;  %2984 = vmatpush3.bf16.msra.mxu1 %v3284_v12 }
  0x26   : > { %2977 = vmatprep.subr.bf16.mxu0 %v3423_v1  ;;  %2985 = vmatprep.subr.bf16.mxu1 %v3423_v1 }
  0x27   : > { %2979 = vmatprep.mubr.msk.bf16.mxu0 %vm3424_vm0, %v3423_v1  ;;  %2987 = vmatprep.mubr.msk.bf16.mxu1 %vm3424_vm0, %v3423_v1 }
  0x29   : > { %2978 = vmatpush3.bf16.msra.mxu0 %v3285_v13  ;;  %2986 = vmatpush3.bf16.msra.mxu1 %v3286_v14 }
  0x2a   : > { %2991 = vmatprep.subr.bf16.mxu0 %v3423_v1  ;;  %2999 = vmatprep.subr.bf16.mxu1 %v3423_v1 }
  0x2c   : > { %2980 = vmatmul.mubr.msk.bf16.vlgmr.msra.gmra.mrb[8].mxu0 %vm313_vm1, %v3530_v8  ;;  %2988 = vmatmul.mubr.msk.bf16.vlgmr.msra.gmra.mrb[8].mxu1 %vm313_vm1, %v3530_v8 }
  0x2d   : > { %2992 = vmatpush3.bf16.msra.mxu0 %v3287_v15  ;;  %3000 = vmatpush3.bf16.msra.mxu1 %v3288_v16  ;;  %v2665_v16 = vld [vmem:[%s4036_s2 + $0x2] ss:$0 sm:$0xff] }
  0x2e   : > { %2993 = vmatprep.subr.bf16.mxu0 %v3423_v1  ;;  %3001 = vmatprep.subr.bf16.mxu1 %v3423_v1 }
  0x2f   : > { %2995 = vmatprep.mubr.msk.bf16.mxu0 %vm3424_vm0, %v3423_v1  ;;  %3003 = vmatprep.mubr.msk.bf16.mxu1 %vm3424_vm0, %v3423_v1 }
  0x31   : > { %2994 = vmatpush3.bf16.msra.mxu0 %v3289_v17  ;;  %3002 = vmatpush3.bf16.msra.mxu1 %v3290_v18  ;;  %v2666_v17 = vld [vmem:[%s4036_s2 + $0x3] ss:$0 sm:$0xff] }
  0x32   : > { %3007 = vmatprep.subr.bf16.mxu0 %v3423_v1  ;;  %3015 = vmatprep.subr.bf16.mxu1 %v3423_v1 }
  0x34   : > { %2996 = vmatmul.mubr.msk.bf16.vlgmr.msra.gmra.mrb[12].mxu0 %vm313_vm1, %v3530_v8  ;;  %3004 = vmatmul.mubr.msk.bf16.vlgmr.msra.gmra.mrb[12].mxu1 %vm313_vm1, %v3530_v8 }
  0x35   : > { %3008 = vmatpush3.bf16.msra.mxu0 %v3291_v19  ;;  %3011 = vmatprep.mubr.msk.bf16.mxu0 %vm3424_vm0, %v3423_v1 }
  0x36   : > { %3009 = vmatprep.subr.bf16.mxu0 %v3423_v1  ;;  %3019 = vmatprep.mubr.msk.bf16.mxu1 %vm3424_vm0, %v3423_v1 }
  0x37   : > { %3016 = vmatpush3.bf16.msra.mxu1 %v3292_v20 }
  0x38   : > { %3017 = vmatprep.subr.bf16.mxu1 %v3423_v1 }
  0x39   : > { %3010 = vmatpush3.bf16.msra.mxu0 %v3293_v21 }
  0x3a   : > { %3023 = vmatprep.subr.bf16.mxu0 %v3423_v1 }
  0x3b   : > { %3018 = vmatpush3.bf16.msra.mxu1 %v3294_v22 }
  0x3c   : > { %3012 = vmatmul.mubr.msk.bf16.vlgmr.msra.gmra.mrb[16].mxu0 %vm313_vm1, %v3530_v8  ;;  %3031 = vmatprep.subr.bf16.mxu1 %v3423_v1 }
  0x3d   : > { %3027 = vmatprep.mubr.msk.bf16.mxu0 %vm3424_vm0, %v3423_v1  ;;  %3024 = vmatpush3.bf16.msra.mxu0 %v3295_v23 }
  0x3e   : > { %3020 = vmatmul.mubr.msk.bf16.vlgmr.msra.gmra.mrb[16].mxu1 %vm313_vm1, %v3530_v8  ;;  %3025 = vmatprep.subr.bf16.mxu0 %v3423_v1 }
  0x3f   : > { %3032 = vmatpush3.bf16.msra.mxu1 %v3296_v24  ;;  %3035 = vmatprep.mubr.msk.bf16.mxu1 %vm3424_vm0, %v3423_v1  ;;  %v2671_v24 = vld [vmem:[%s4036_s2 + $0x8] ss:$0 sm:$0xff] }
  0x40   : > { %3033 = vmatprep.subr.bf16.mxu1 %v3423_v1 }
  0x41   : > { %3026 = vmatpush3.bf16.msra.mxu0 %v3297_v25 }
  0x42   : > { %3039 = vmatprep.subr.bf16.mxu0 %v3423_v1 }
  0x43   : > { %3034 = vmatpush3.bf16.msra.mxu1 %v3298_v26  ;;  %v2672_v26 = vld [vmem:[%s4036_s2 + $0x9] ss:$0 sm:$0xff] }
  0x44   : > { %3045 = vmatprep.subr.bf16.mxu1 %v3423_v1  ;;  %3028 = vmatmul.mubr.msk.bf16.vlgmr.msra.gmra.mrb[20].mxu0 %vm313_vm1, %v3530_v8 }
  0x45   : > { %3041 = vmatprep.mubr.msk.bf16.mxu0 %vm3424_vm0, %v3423_v1 }
  0x46   : > { %3036 = vmatmul.mubr.msk.bf16.vlgmr.msra.gmra.mrb[20].mxu1 %vm313_vm1, %v3530_v8 }
  0x47   : > { %3047 = vmatprep.mubr.msk.bf16.mxu1 %vm3424_vm0, %v3423_v1 }
  0xef   : > { %v351_v27 = vpop.f32.mrb[0].mxu0  ;;  %v403_v28 = vpop.f32.mrb[0].mxu1 }
  0xf0   : > { %v2949_v29 = vpop.f32.mrb[1].mxu0  ;;  %v2957_v30 = vpop.f32.mrb[1].mxu1  ;;  %v352_v63 = vadd.f32 %v2663_v57, %v351_v27  ;;  %v404_v0 = vadd.f32 %v2664_v58, %v403_v28 }
  0xf1   : > { %v354_v31 = vpop.f32.mrb[2].mxu0  ;;  %v406_v32 = vpop.f32.mrb[2].mxu1 }
  0xf2   : > { %v2950_v33 = vpop.f32.mrb[3].mxu0  ;;  %v2958_v34 = vpop.f32.mrb[3].mxu1  ;;  %v929_v10 = vpack.c.bf16 %v352_v63, %v352_v63  ;;  %v930_v11 = vpack.c.bf16 %v404_v0, %v404_v0 }
  0xf7   : > { %v455_v35 = vpop.f32.mrb[4].mxu0  ;;  %v507_v36 = vpop.f32.mrb[4].mxu1 }
  0xf8   : > { %v2965_v37 = vpop.f32.mrb[5].mxu0  ;;  %v2973_v38 = vpop.f32.mrb[5].mxu1  ;;  %v456_v20 = vadd.f32 %v2665_v16, %v455_v35  ;;  %v508_v21 = vadd.f32 %v2666_v17, %v507_v36 }
  0xf9   : > { %v458_v39 = vpop.f32.mrb[6].mxu0  ;;  %v510_v40 = vpop.f32.mrb[6].mxu1 }
  0xfa   : > { %v2966_v41 = vpop.f32.mrb[7].mxu0  ;;  %v2974_v42 = vpop.f32.mrb[7].mxu1  ;;  %v931_v22 = vpack.c.bf16 %v456_v20, %v456_v20  ;;  %v932_v23 = vpack.c.bf16 %v508_v21, %v508_v21 }
  0xff   : > { %v559_v45 = vpop.f32.mrb[8].mxu0  ;;  %v611_v46 = vpop.f32.mrb[8].mxu1 }
 0x100   : > { %v560_v47 = vadd.f32 %v2667_v43, %v559_v45  ;;  %v612_v48 = vadd.f32 %v2668_v44, %v611_v46  ;;  %v2981_v49 = vpop.f32.mrb[9].mxu0  ;;  %v2989_v50 = vpop.f32.mrb[9].mxu1 }
 0x101   : > { %v562_v51 = vpop.f32.mrb[10].mxu0  ;;  %v614_v52 = vpop.f32.mrb[10].mxu1 }
 0x102   : > { %v933_v53 = vpack.c.bf16 %v560_v47, %v560_v47  ;;  %v934_v54 = vpack.c.bf16 %v612_v48, %v612_v48  ;;  %v2982_v55 = vpop.f32.mrb[11].mxu0  ;;  %v2990_v56 = vpop.f32.mrb[11].mxu1 }
 0x104   : > { %v942_v59 = vsel %vm937_vm2, %v933_v53, 0  ;;  %v988_v60 = vsel %vm937_vm2, %v934_v54, 0 }
 0x105   : > { %3040 = vmatpush3.bf16.xpose.msra.mxu0 %v942_v59  ;;  %3046 = vmatpush3.bf16.xpose.msra.mxu1 %v988_v60 }
 0x106   : > { %3051 = vmatprep.subr.bf16.mxu0 %v3423_v1  ;;  %3057 = vmatprep.subr.bf16.mxu1 %v3423_v1 }
 0x107   : > { %v663_v2 = vpop.f32.mrb[12].mxu0  ;;  %v715_v3 = vpop.f32.mrb[12].mxu1 }
 0x108   : > { %v664_v4 = vadd.f32 %v2669_v61, %v663_v2  ;;  %v716_v5 = vadd.f32 %v2670_v62, %v715_v3  ;;  %v2997_v6 = vpop.f32.mrb[13].mxu0  ;;  %v3005_v7 = vpop.f32.mrb[13].mxu1 }
 0x109   : > { %v666_v8 = vpop.f32.mrb[14].mxu0  ;;  %v718_v9 = vpop.f32.mrb[14].mxu1 }
 0x10a   : > { %v935_v12 = vpack.c.bf16 %v664_v4, %v664_v4  ;;  %v936_v13 = vpack.c.bf16 %v716_v5, %v716_v5  ;;  %v2998_v14 = vpop.f32.mrb[15].mxu0  ;;  %v3006_v15 = vpop.f32.mrb[15].mxu1 }
 0x10c   : > { %v1034_v18 = vsel %vm937_vm2, %v935_v12, 0  ;;  %v1080_v19 = vsel %vm937_vm2, %v936_v13, 0  ;;  %3042 = vmatmul.mubr.msk.bf16.vlgmr.msra.gmra.mrb[24].mxu0 %vm937_vm2, %v929_v10  ;;  %3048 = vmatmul.mubr.msk.bf16.vlgmr.msra.gmra.mrb[24].mxu1 %vm937_vm2, %v930_v11 }
 0x10d   : > { %3052 = vmatpush3.bf16.xpose.msra.mxu0 %v1034_v18  ;;  %3058 = vmatpush3.bf16.xpose.msra.mxu1 %v1080_v19 }
 0x10e   : > { %3053 = vmatprep.mubr.msk.bf16.mxu0 %vm3424_vm0, %v3423_v1  ;;  %3059 = vmatprep.mubr.msk.bf16.mxu1 %vm3424_vm0, %v3423_v1 }
 0x10f   : > { %3063 = vmatprep.subr.bf16.mxu0 %v3423_v1  ;;  %3069 = vmatprep.subr.bf16.mxu1 %v3423_v1  ;;  %v767_v25 = vpop.f32.mrb[16].mxu0 }
 0x110   : > { %v768_v27 = vadd.f32 %v2671_v24, %v767_v25  ;;  %v3013_v28 = vpop.f32.mrb[17].mxu0 }
 0x111   : > { %v770_v29 = vpop.f32.mrb[18].mxu0  ;;  %v819_v30 = vpop.f32.mrb[16].mxu1 }
 0x112   : > { %v1170_v31 = vpack.c.bf16 %v768_v27, %v768_v27  ;;  %v3014_v32 = vpop.f32.mrb[19].mxu0  ;;  %v820_v33 = vadd.f32 %v2672_v26, %v819_v30  ;;  %v3021_v34 = vpop.f32.mrb[17].mxu1  ;;  %v2673_v27 = vld [vmem:[%s4036_s2 + $0xa] ss:$0 sm:$0xff]  ;;  %v2674_v30 = vld [vmem:[%s4036_s2 + $0xb] ss:$0 sm:$0xff] }
 0x113   : > { %v822_v35 = vpop.f32.mrb[18].mxu1 }
 0x114   : > { %3054 = vmatmul.mubr.msk.bf16.vlgmr.msra.gmra.mrb[28].mxu0 %vm937_vm2, %v931_v22  ;;  %3060 = vmatmul.mubr.msk.bf16.vlgmr.msra.gmra.mrb[28].mxu1 %vm937_vm2, %v932_v23  ;;  %v1179_v36 = vsel %vm1177_vm3, %v1170_v31, 0  ;;  %v1171_v37 = vpack.c.bf16 %v820_v33, %v820_v33  ;;  %v3022_v38 = vpop.f32.mrb[19].mxu1 }
 0x115   : > { %3065 = vmatprep.mubr.msk.bf16.mxu0 %vm3424_vm0, %v3423_v1  ;;  %3071 = vmatprep.mubr.msk.bf16.mxu1 %vm3424_vm0, %v3423_v1 }
 0x116   : > { %3064 = vmatpush3.bf16.msra.mxu0 %v1179_v36  ;;  %v1225_v39 = vsel %vm1177_vm3, %v1171_v37, 0 }
 0x117   : > { %3075 = vmatprep.subr.bf16.mxu0 %v3423_v1  ;;  %3070 = vmatpush3.bf16.msra.mxu1 %v1225_v39  ;;  %v3708_v40 = vpop.f32.mrb[20].mxu0 }
 0x118   : > { %3081 = vmatprep.subr.bf16.mxu1 %v3423_v1  ;;  %v3029_v42 = vpop.f32.mrb[21].mxu0  ;;  %v872_v28 = vadd.f32 %v2673_v27, %v3708_v40  ;;  %v3316_v27 = vld [vmem:[%s4035_s1 + $0x150] sm:$0xff]  }
 0x119   : > { %v3710_v41 = vpop.f32.mrb[20].mxu1  ;;  %v874_v44 = vpop.f32.mrb[22].mxu0 }
 0x11a   : > { %v3037_v43 = vpop.f32.mrb[21].mxu1  ;;  %v3030_v46 = vpop.f32.mrb[23].mxu0  ;;  %v1172_v32 = vpack.c.bf16 %v872_v28, %v872_v28  ;;  %v924_v33 = vadd.f32 %v2674_v30, %v3710_v41  ;;  %v3317_v28 = vld [vmem:[%s4035_s1 + $0x148] sm:$0xff]   ;;  %v3319_v30 = vld [vmem:[%s4035_s1 + $0x160] sm:$0xff]  }
 0x11b   : > { %v926_v45 = vpop.f32.mrb[22].mxu1 }
 0x11c   : > { %v3038_v47 = vpop.f32.mrb[23].mxu1  ;;  %v1271_v38 = vsel %vm1177_vm3, %v1172_v32, 0  ;;  %v1173_v39 = vpack.c.bf16 %v924_v33, %v924_v33  ;;  %v3321_v32 = vld [vmem:[%s4035_s1 + $0x168] sm:$0xff]   ;;  %v3322_v33 = vld [vmem:[%s4035_s1 + $0x178] sm:$0xff]  }
 0x11e   : > { %v1317_v41 = vsel %vm1177_vm3, %v1173_v39, 0 }
 0x1df   : > { %v978_v48 = vpop.f32.mrb[24].mxu0  ;;  %v1024_v49 = vpop.f32.mrb[24].mxu1 }
 0x1e0   : > { %v3043_v50 = vpop.f32.mrb[25].mxu0  ;;  %v3049_v51 = vpop.f32.mrb[25].mxu1  ;;  %v1122_v52 = vsel %vm937_vm2, %v978_v48, -inf  ;;  %v1125_v57 = vsel %vm937_vm2, %v1024_v49, -inf }
 0x1e1   : > { %v1027_v53 = vpop.f32.mrb[26].mxu1  ;;  %1123 = vmax.xlane.f32.xlu0 %v1122_v52  ;;  %v981_v54 = vpop.f32.mrb[26].mxu0 }
 0x1e2   : > { %v3044_v55 = vpop.f32.mrb[27].mxu0  ;;  %v3050_v56 = vpop.f32.mrb[27].mxu1 }
 0x1e3   : > { %v3299_v56 = vld [vmem:[%s4035_s1 + $0xc0] sm:$0xff]  }
 0x1e5   : > { %1126 = vmax.xlane.f32.xlu0 %v1125_v57  ;;  %v3300_v57 = vld [vmem:[%s4035_s1 + $0xd0] sm:$0xff]  }
 0x1e7   : > { %v1070_v58 = vpop.f32.mrb[28].mxu0  ;;  %v1116_v59 = vpop.f32.mrb[28].mxu1 }
 0x1e8   : > { %v3055_v60 = vpop.f32.mrb[29].mxu0  ;;  %v3061_v61 = vpop.f32.mrb[29].mxu1  ;;  %v1128_v62 = vsel %vm937_vm2, %v1070_v58, -inf  ;;  %v1131_v4 = vsel %vm937_vm2, %v1116_v59, -inf }
 0x1e9   : > { %v1119_v63 = vpop.f32.mrb[30].mxu1  ;;  %1129 = vmax.xlane.f32.xlu1 %v1128_v62  ;;  %v1073_v0 = vpop.f32.mrb[30].mxu0  ;;  %v3301_v62 = vld [vmem:[%s4035_s1 + $0xc8] sm:$0xff]  }
 0x1ea   : > { %v3056_v2 = vpop.f32.mrb[31].mxu0  ;;  %v3062_v3 = vpop.f32.mrb[31].mxu1  ;;  %v3302_v63 = vld [vmem:[%s4035_s1 + $0xd8] sm:$0xff]  }
 0x1ed   : > { %1132 = vmax.xlane.f32.xlu1 %v1131_v4 }
 0x26e   : > { %v1124_v5 = vpop.xlane.xlu0 %1123 }
 0x26f   : > { %v1134_v6 = vsub.f32 %v978_v48, %v1124_v5 }
 0x271   : > { %v1138_v7 = vmul.f32 1.442695, %v1134_v6 }
 0x272   : > { %v1127_v8 = vpop.xlane.xlu0 %1126 }
 0x273   : > { %3323 = vpow2.f32 %v1138_v7  ;;  %v1135_v9 = vsub.f32 %v1024_v49, %v1127_v8 }
 0x275   : > { %v1140_v10 = vmul.f32 1.442695, %v1135_v9 }
 0x276   : > { %v1130_v11 = vpop.xlane.xlu1 %1129 }
 0x277   : > { %3325 = vpow2.f32 %v1140_v10  ;;  %v1136_v12 = vsub.f32 %v1070_v58, %v1130_v11 }
 0x279   : > { %v1142_v13 = vmul.f32 1.442695, %v1136_v12 }
 0x27a   : > { %v1133_v14 = vpop.xlane.xlu1 %1132 }
 0x27b   : > { %3327 = vpow2.f32 %v1142_v13  ;;  %v1137_v15 = vsub.f32 %v1116_v59, %v1133_v14  ;;  %v3303_v13 = vld [vmem:[%s4035_s1 + $0xe0] sm:$0xff]   ;;  %v3304_v14 = vld [vmem:[%s4035_s1 + $0xf0] sm:$0xff]  }
 0x27d   : > { %v3324_v16 = vpop.eup %3323  ;;  %v1144_v17 = vmul.f32 1.442695, %v1137_v15 }
 0x27e   : > { %v1146_v18 = vsel %vm937_vm2, %v3324_v16, 0.0 }
 0x27f   : > { %3329 = vpow2.f32 %v1144_v17  ;;  %1147 = vadd.xlane.f32.xlu0 %v1146_v18  ;;  %v3306_v17 = vld [vmem:[%s4035_s1 + $0xf8] sm:$0xff]   ;;  %v3307_v18 = vld [vmem:[%s4035_s1 + $0x100] sm:$0xff]  }
 0x281   : > { %v3326_v19 = vpop.eup %3325 }
 0x282   : > { %v1149_v20 = vsel %vm937_vm2, %v3326_v19, 0.0 }
 0x283   : > { %1150 = vadd.xlane.f32.xlu1 %v1149_v20  ;;  %v3309_v20 = vld [vmem:[%s4035_s1 + $0x108] sm:$0xff]  }
 0x285   : > { %v3328_v21 = vpop.eup %3327 }
 0x286   : > { %v1152_v22 = vsel %vm937_vm2, %v3328_v21, 0.0 }
 0x287   : > { %1153 = vadd.xlane.f32.xlu0 %v1152_v22  ;;  %v3311_v22 = vld [vmem:[%s4035_s1 + $0x120] sm:$0xff]  }
 0x289   : > { %v3330_v23 = vpop.eup %3329 }
 0x28a   : > { %v1155_v24 = vsel %vm937_vm2, %v3330_v23, 0.0 }
 0x28b   : > { %1156 = vadd.xlane.f32.xlu1 %v1155_v24  ;;  %v3313_v24 = vld [vmem:[%s4035_s1 + $0x128] sm:$0xff]  }
 0x30c   : > { %v1148_v25 = vpop.xlane.xlu0 %1147 }
 0x30d   : > { %3331 = vrcp.f32 %v1148_v25  ;;  %v3314_v25 = vld [vmem:[%s4035_s1 + $0x138] sm:$0xff]  }
 0x310   : > { %v1151_v26 = vpop.xlane.xlu1 %1150 }
 0x311   : > { %3333 = vrcp.f32 %v1151_v26  ;;  %v3315_v26 = vld [vmem:[%s4035_s1 + $0x140] sm:$0xff]  }
 0x314   : > { %v1154_v29 = vpop.xlane.xlu0 %1153 }
 0x315   : > { %3335 = vrcp.f32 %v1154_v29  ;;  %v3318_v29 = vld [vmem:[%s4035_s1 + $0x158] sm:$0xff]  }
 0x317   : > { %v3332_v31 = vpop.eup %3331 }
 0x318   : > { %v1159_v34 = vmul.f32 %v3332_v31, %v3324_v16  ;;  %v1157_v35 = vpop.xlane.xlu1 %1156  ;;  %v3305_v16 = vld [vmem:[%s4035_s1 + $0xe8] sm:$0xff]   ;;  %v3320_v31 = vld [vmem:[%s4035_s1 + $0x170] sm:$0xff]  }
 0x319   : > { %3337 = vrcp.f32 %v1157_v35 }
 0x31a   : > { %v1166_v36 = vpack.c.bf16 %v1159_v34, %v1159_v34 }
 0x31b   : > { %v3334_v37 = vpop.eup %3333 }
 0x31c   : > { %v1161_v42 = vmul.f32 %v3334_v37, %v3326_v19  ;;  %3066 = vmatmul.mubr.msk.bf16.vlgmr.msra.gmra.mrb[32].mxu0 %vm937_vm2, %v1166_v36  ;;  %v3308_v19 = vld [vmem:[%s4035_s1 + $0x110] sm:$0xff]  }
 0x31d   : > { %3076 = vmatpush3.bf16.msra.mxu0 %v1271_v38  ;;  %3077 = vmatprep.mubr.msk.bf16.mxu0 %vm3424_vm0, %v3423_v1 }
 0x31e   : > { %v1167_v40 = vpack.c.bf16 %v1161_v42, %v1161_v42  ;;  %3087 = vmatprep.subr.bf16.mxu0 %v3423_v1 }
 0x31f   : > { %v3336_v43 = vpop.eup %3335 }
 0x320   : > { %v1163_v44 = vmul.f32 %v3336_v43, %v3328_v21  ;;  %3072 = vmatmul.mubr.msk.bf16.vlgmr.msra.gmra.mrb[32].mxu1 %vm937_vm2, %v1167_v40  ;;  %v3310_v21 = vld [vmem:[%s4035_s1 + $0x118] sm:$0xff]  }
 0x321   : > { %3082 = vmatpush3.bf16.msra.mxu1 %v1317_v41  ;;  %3083 = vmatprep.mubr.msk.bf16.mxu1 %vm3424_vm0, %v3423_v1 }
 0x322   : > { %v1168_v45 = vpack.c.bf16 %v1163_v44, %v1163_v44  ;;  %3095 = vmatprep.subr.bf16.mxu1 %v3423_v1 }
 0x323   : > { %v3338_v46 = vpop.eup %3337 }
 0x324   : > { %v1165_v47 = vmul.f32 %v3338_v46, %v3330_v23  ;;  %3078 = vmatmul.mubr.msk.bf16.vlgmr.msra.gmra.mrb[36].mxu0 %vm937_vm2, %v1168_v45  ;;  %v3312_v23 = vld [vmem:[%s4035_s1 + $0x130] sm:$0xff]  }
 0x325   : > { %3091 = vmatprep.mubr.msk.bf16.mxu0 %vm3424_vm0, %v3423_v1  ;;  %3088 = vmatpush3.bf16.msra.mxu0 %v3299_v56 }
 0x326   : > { %v1169_v48 = vpack.c.bf16 %v1165_v47, %v1165_v47  ;;  %3089 = vmatprep.subr.bf16.mxu0 %v3423_v1 }
 0x328   : > { %3084 = vmatmul.mubr.msk.bf16.vlgmr.msra.gmra.mrb[36].mxu1 %vm937_vm2, %v1169_v48 }
 0x329   : > { %3099 = vmatprep.mubr.msk.bf16.mxu1 %vm3424_vm0, %v3423_v1  ;;  %3096 = vmatpush3.bf16.msra.mxu1 %v3300_v57 }
 0x32a   : > { %3097 = vmatprep.subr.bf16.mxu1 %v3423_v1  ;;  %3090 = vmatpush3.bf16.msra.mxu0 %v3301_v62 }
 0x32b   : > { %3103 = vmatprep.subr.bf16.mxu0 %v3423_v1 }
 0x32d   : > { %3098 = vmatpush3.bf16.msra.mxu1 %v3302_v63 }
 0x32e   : > { %3111 = vmatprep.subr.bf16.mxu1 %v3423_v1 }
 0x3ef   : > { %v1215_v49 = vpop.f32.mrb[32].mxu0 }
 0x3f0   : > { %v3067_v50 = vpop.f32.mrb[33].mxu0 }
 0x3f1   : > { %v1218_v51 = vpop.f32.mrb[34].mxu0  ;;  %v2783_v50 = vld [vmem:[%s4036_s2 + $0x10] ss:$0 sm:$0xff] }
 0x3f2   : > { %v3068_v52 = vpop.f32.mrb[35].mxu0  ;;  %v2784_v51 = vld [vmem:[%s4036_s2 + $0x11] ss:$0 sm:$0xff] }
 0x3f3   : > { %v1261_v53 = vpop.f32.mrb[32].mxu1 }
 0x3f4   : > { %1360 = vrot.lane.b32.xlu0 %v1261_v53, %s3425_s29  ;;  %v3073_v54 = vpop.f32.mrb[33].mxu1 }
 0x3f5   : > { %v1264_v55 = vpop.f32.mrb[34].mxu1 }
 0x3f6   : > { %v3074_v58 = vpop.f32.mrb[35].mxu1 }
 0x3f7   : > { %v1307_v59 = vpop.f32.mrb[36].mxu0 }
 0x3f8   : > { %1364 = vrot.lane.b32.xlu1 %v1307_v59, %s3426_s7  ;;  %v3079_v60 = vpop.f32.mrb[37].mxu0 }
 0x3f9   : > { %v1310_v61 = vpop.f32.mrb[38].mxu0 }
 0x3fa   : > { %v3080_v0 = vpop.f32.mrb[39].mxu0 }
 0x3fb   : > { %v1353_v2 = vpop.f32.mrb[36].mxu1  ;;  %v2779_v0 = vld [vmem:[%s4036_s2 + $0xc] ss:$0 sm:$0xff] }
 0x3fc   : > { %v3085_v3 = vpop.f32.mrb[37].mxu1  ;;  %1368 = vrot.lane.b32.xlu1 %v1353_v2, %s3427_s17  ;;  %v2780_v2 = vld [vmem:[%s4036_s2 + $0xd] ss:$0 sm:$0xff] }
 0x3fd   : > { %v1356_v4 = vpop.f32.mrb[38].mxu1 }
 0x3fe   : > { %v3086_v5 = vpop.f32.mrb[39].mxu1 }
 0x3ff   : > { %v2785_v5 = vld [vmem:[%s4036_s2 + $0x12] ss:$0 sm:$0xff] }
 0x466   : > { %v1361_v6 = vpop.permute.xlu0 %1360 }
 0x467   : > { %v1371_v8 = vsel %vm937_vm2, %v1215_v49, %v1361_v6  ;;  %v2786_v6 = vld [vmem:[%s4036_s2 + $0x13] ss:$0 sm:$0xff] }
 0x46a   : > { %v1365_v7 = vpop.permute.xlu1 %1364 }
 0x46b   : > { %v1373_v9 = vsel %vm1372_vm4, %v1371_v8, %v1365_v7 }
 0x46e   : > { %v1369_v10 = vpop.permute.xlu1 %1368 }
 0x46f   : > { %v1375_v11 = vsel %vm1374_vm5, %v1373_v9, %v1369_v10 }
 0x470   : > { %3339 = vtanh.f32 %v1375_v11 }
 0x47a   : > { %v3340_v12 = vpop.eup %3339 }
 0x47b   : > { %v3772_v15 = vpack.c.bf16 %v3340_v12, %v3340_v12 }
 0x47d   : > { %3092 = vmatmul.mubr.msk.bf16.vlgmr.msra.gmra.mrb[40].mxu0 %vm313_vm1, %v3772_v15  ;;  %3100 = vmatmul.mubr.msk.bf16.vlgmr.msra.gmra.mrb[40].mxu1 %vm313_vm1, %v3772_v15 }
 0x47e   : > { %3104 = vmatpush3.bf16.msra.mxu0 %v3303_v13  ;;  %3112 = vmatpush3.bf16.msra.mxu1 %v3304_v14 }
 0x47f   : > { %3105 = vmatprep.subr.bf16.mxu0 %v3423_v1  ;;  %3113 = vmatprep.subr.bf16.mxu1 %v3423_v1 }
 0x480   : > { %3107 = vmatprep.mubr.msk.bf16.mxu0 %vm3424_vm0, %v3423_v1  ;;  %3115 = vmatprep.mubr.msk.bf16.mxu1 %vm3424_vm0, %v3423_v1 }
 0x482   : > { %3106 = vmatpush3.bf16.msra.mxu0 %v3305_v16  ;;  %3114 = vmatpush3.bf16.msra.mxu1 %v3306_v17 }
 0x483   : > { %3119 = vmatprep.subr.bf16.mxu0 %v3423_v1  ;;  %3127 = vmatprep.subr.bf16.mxu1 %v3423_v1 }
 0x485   : > { %3108 = vmatmul.mubr.msk.bf16.vlgmr.msra.gmra.mrb[44].mxu0 %vm313_vm1, %v3772_v15  ;;  %3116 = vmatmul.mubr.msk.bf16.vlgmr.msra.gmra.mrb[44].mxu1 %vm313_vm1, %v3772_v15 }
 0x486   : > { %3120 = vmatpush3.bf16.msra.mxu0 %v3307_v18  ;;  %3128 = vmatpush3.bf16.msra.mxu1 %v3308_v19 }
 0x487   : > { %3121 = vmatprep.subr.bf16.mxu0 %v3423_v1  ;;  %3129 = vmatprep.subr.bf16.mxu1 %v3423_v1 }
 0x488   : > { %3123 = vmatprep.mubr.msk.bf16.mxu0 %vm3424_vm0, %v3423_v1  ;;  %3131 = vmatprep.mubr.msk.bf16.mxu1 %vm3424_vm0, %v3423_v1 }
 0x48a   : > { %3122 = vmatpush3.bf16.msra.mxu0 %v3309_v20  ;;  %3130 = vmatpush3.bf16.msra.mxu1 %v3310_v21 }
 0x48b   : > { %3135 = vmatprep.subr.bf16.mxu0 %v3423_v1  ;;  %3143 = vmatprep.subr.bf16.mxu1 %v3423_v1 }
 0x48d   : > { %3124 = vmatmul.mubr.msk.bf16.vlgmr.msra.gmra.mrb[48].mxu0 %vm313_vm1, %v3772_v15  ;;  %3132 = vmatmul.mubr.msk.bf16.vlgmr.msra.gmra.mrb[48].mxu1 %vm313_vm1, %v3772_v15 }
 0x48e   : > { %3136 = vmatpush3.bf16.msra.mxu0 %v3311_v22  ;;  %3144 = vmatpush3.bf16.msra.mxu1 %v3312_v23  ;;  %v2781_v23 = vld [vmem:[%s4036_s2 + $0xe] ss:$0 sm:$0xff] }
 0x48f   : > { %3137 = vmatprep.subr.bf16.mxu0 %v3423_v1  ;;  %3145 = vmatprep.subr.bf16.mxu1 %v3423_v1 }
 0x490   : > { %3139 = vmatprep.mubr.msk.bf16.mxu0 %vm3424_vm0, %v3423_v1  ;;  %3147 = vmatprep.mubr.msk.bf16.mxu1 %vm3424_vm0, %v3423_v1 }
 0x492   : > { %3138 = vmatpush3.bf16.msra.mxu0 %v3313_v24  ;;  %3146 = vmatpush3.bf16.msra.mxu1 %v3314_v25  ;;  %v2782_v24 = vld [vmem:[%s4036_s2 + $0xf] ss:$0 sm:$0xff] }
 0x493   : > { %3151 = vmatprep.subr.bf16.mxu0 %v3423_v1  ;;  %3159 = vmatprep.subr.bf16.mxu1 %v3423_v1 }
 0x495   : > { %3140 = vmatmul.mubr.msk.bf16.vlgmr.msra.gmra.mrb[52].mxu0 %vm313_vm1, %v3772_v15  ;;  %3148 = vmatmul.mubr.msk.bf16.vlgmr.msra.gmra.mrb[52].mxu1 %vm313_vm1, %v3772_v15 }
 0x496   : > { %3152 = vmatpush3.bf16.msra.mxu0 %v3315_v26  ;;  %3160 = vmatpush3.bf16.msra.mxu1 %v3316_v27  ;;  %v2787_v27 = vld [vmem:[%s4036_s2 + $0x14] ss:$0 sm:$0xff] }
 0x497   : > { %3153 = vmatprep.subr.bf16.mxu0 %v3423_v1  ;;  %3161 = vmatprep.subr.bf16.mxu1 %v3423_v1 }
 0x498   : > { %3155 = vmatprep.mubr.msk.bf16.mxu0 %vm3424_vm0, %v3423_v1  ;;  %3163 = vmatprep.mubr.msk.bf16.mxu1 %vm3424_vm0, %v3423_v1 }
 0x49a   : > { %3154 = vmatpush3.bf16.msra.mxu0 %v3317_v28  ;;  %3162 = vmatpush3.bf16.msra.mxu1 %v3318_v29  ;;  %v2788_v28 = vld [vmem:[%s4036_s2 + $0x15] ss:$0 sm:$0xff] }
 0x49b   : > { %3167 = vmatprep.subr.bf16.mxu0 %v3423_v1  ;;  %3175 = vmatprep.subr.bf16.mxu1 %v3423_v1 }
 0x49d   : > { %3156 = vmatmul.mubr.msk.bf16.vlgmr.msra.gmra.mrb[56].mxu0 %vm313_vm1, %v3772_v15  ;;  %3164 = vmatmul.mubr.msk.bf16.vlgmr.msra.gmra.mrb[56].mxu1 %vm313_vm1, %v3772_v15 }
 0x49e   : > { %3168 = vmatpush3.bf16.msra.mxu0 %v3319_v30  ;;  %3176 = vmatpush3.bf16.msra.mxu1 %v3320_v31 }
 0x49f   : > { %3169 = vmatprep.subr.bf16.mxu0 %v3423_v1  ;;  %3177 = vmatprep.subr.bf16.mxu1 %v3423_v1 }
 0x4a0   : > { %3171 = vmatprep.mubr.msk.bf16.mxu0 %vm3424_vm0, %v3423_v1  ;;  %3179 = vmatprep.mubr.msk.bf16.mxu1 %vm3424_vm0, %v3423_v1 }
 0x4a2   : > { %3170 = vmatpush3.bf16.msra.mxu0 %v3321_v32  ;;  %3178 = vmatpush3.bf16.msra.mxu1 %v3322_v33 }
 0x4a3   : > { %3183 = vmatprep.subr.bf16.mxu0 %v3423_v1  ;;  %3189 = vmatprep.subr.bf16.mxu1 %v3423_v1 }
 0x4a5   : > { %3172 = vmatmul.mubr.msk.bf16.vlgmr.msra.gmra.mrb[60].mxu0 %vm313_vm1, %v3772_v15  ;;  %3180 = vmatmul.mubr.msk.bf16.vlgmr.msra.gmra.mrb[60].mxu1 %vm313_vm1, %v3772_v15 }
 0x4a6   : > { %3185 = vmatprep.mubr.msk.bf16.mxu0 %vm3424_vm0, %v3423_v1  ;;  %3191 = vmatprep.mubr.msk.bf16.mxu1 %vm3424_vm0, %v3423_v1 }
 0x550   : > { %v1561_v34 = vpop.f32.mrb[40].mxu0  ;;  %v1613_v35 = vpop.f32.mrb[40].mxu1 }
 0x551   : > { %v3093_v36 = vpop.f32.mrb[41].mxu0  ;;  %v3101_v37 = vpop.f32.mrb[41].mxu1  ;;  %v1562_v7 = vadd.f32 %v2779_v0, %v1561_v34  ;;  %v1614_v8 = vadd.f32 %v2780_v2, %v1613_v35 }
 0x552   : > { %v1564_v38 = vpop.f32.mrb[42].mxu0  ;;  %v1616_v39 = vpop.f32.mrb[42].mxu1 }
 0x553   : > { %v3094_v42 = vpop.f32.mrb[43].mxu0  ;;  %v3102_v40 = vpop.f32.mrb[43].mxu1  ;;  %v2139_v17 = vpack.c.bf16 %v1562_v7, %v1562_v7  ;;  %v2140_v18 = vpack.c.bf16 %v1614_v8, %v1614_v8 }
 0x558   : > { %v1665_v43 = vpop.f32.mrb[44].mxu0  ;;  %v1717_v41 = vpop.f32.mrb[44].mxu1 }
 0x559   : > { %v3109_v44 = vpop.f32.mrb[45].mxu0  ;;  %v3117_v45 = vpop.f32.mrb[45].mxu1  ;;  %v1666_v29 = vadd.f32 %v2781_v23, %v1665_v43  ;;  %v1718_v30 = vadd.f32 %v2782_v24, %v1717_v41 }
 0x55a   : > { %v1668_v46 = vpop.f32.mrb[46].mxu0  ;;  %v1720_v47 = vpop.f32.mrb[46].mxu1 }
 0x55b   : > { %v3110_v48 = vpop.f32.mrb[47].mxu0  ;;  %v3118_v49 = vpop.f32.mrb[47].mxu1  ;;  %v2141_v39 = vpack.c.bf16 %v1666_v29, %v1666_v29  ;;  %v2142_v42 = vpack.c.bf16 %v1718_v30, %v1718_v30 }
 0x560   : > { %v1769_v52 = vpop.f32.mrb[48].mxu0  ;;  %v1821_v53 = vpop.f32.mrb[48].mxu1 }
 0x561   : > { %v1770_v54 = vadd.f32 %v2783_v50, %v1769_v52  ;;  %v1822_v55 = vadd.f32 %v2784_v51, %v1821_v53  ;;  %v3125_v56 = vpop.f32.mrb[49].mxu0  ;;  %v3133_v57 = vpop.f32.mrb[49].mxu1 }
 0x562   : > { %v1772_v58 = vpop.f32.mrb[50].mxu0  ;;  %v1824_v59 = vpop.f32.mrb[50].mxu1 }
 0x563   : > { %v2143_v60 = vpack.c.bf16 %v1770_v54, %v1770_v54  ;;  %v2144_v61 = vpack.c.bf16 %v1822_v55, %v1822_v55  ;;  %v3126_v62 = vpop.f32.mrb[51].mxu0  ;;  %v3134_v63 = vpop.f32.mrb[51].mxu1 }
 0x565   : > { %v2151_v3 = vsel %vm937_vm2, %v2143_v60, 0  ;;  %v2197_v4 = vsel %vm937_vm2, %v2144_v61, 0 }
 0x566   : > { %3184 = vmatpush3.bf16.xpose.msra.mxu0 %v2151_v3  ;;  %3190 = vmatpush3.bf16.xpose.msra.mxu1 %v2197_v4 }
 0x567   : > { %3195 = vmatprep.subr.bf16.mxu0 %v3423_v1  ;;  %3201 = vmatprep.subr.bf16.mxu1 %v3423_v1 }
 0x568   : > { %v1873_v9 = vpop.f32.mrb[52].mxu0  ;;  %v1925_v10 = vpop.f32.mrb[52].mxu1 }
 0x569   : > { %v1874_v11 = vadd.f32 %v2785_v5, %v1873_v9  ;;  %v1926_v12 = vadd.f32 %v2786_v6, %v1925_v10  ;;  %v3141_v13 = vpop.f32.mrb[53].mxu0  ;;  %v3149_v14 = vpop.f32.mrb[53].mxu1 }
 0x56a   : > { %v1876_v15 = vpop.f32.mrb[54].mxu0  ;;  %v1928_v16 = vpop.f32.mrb[54].mxu1 }
 0x56b   : > { %v2145_v19 = vpack.c.bf16 %v1874_v11, %v1874_v11  ;;  %v2146_v20 = vpack.c.bf16 %v1926_v12, %v1926_v12  ;;  %v3142_v21 = vpop.f32.mrb[55].mxu0  ;;  %v3150_v22 = vpop.f32.mrb[55].mxu1 }
 0x56d   : > { %v2243_v25 = vsel %vm937_vm2, %v2145_v19, 0  ;;  %v2289_v26 = vsel %vm937_vm2, %v2146_v20, 0  ;;  %3186 = vmatmul.mubr.msk.bf16.vlgmr.msra.gmra.mrb[64].mxu0 %vm937_vm2, %v2139_v17  ;;  %3192 = vmatmul.mubr.msk.bf16.vlgmr.msra.gmra.mrb[64].mxu1 %vm937_vm2, %v2140_v18 }
 0x56e   : > { %3196 = vmatpush3.bf16.xpose.msra.mxu0 %v2243_v25  ;;  %3202 = vmatpush3.bf16.xpose.msra.mxu1 %v2289_v26 }
 0x56f   : > { %3197 = vmatprep.mubr.msk.bf16.mxu0 %vm3424_vm0, %v3423_v1  ;;  %3203 = vmatprep.mubr.msk.bf16.mxu1 %vm3424_vm0, %v3423_v1 }
 0x570   : > { %v1977_v31 = vpop.f32.mrb[56].mxu0  ;;  %v2029_v32 = vpop.f32.mrb[56].mxu1  ;;  %3207 = vmatprep.subr.bf16.mxu0 %v3423_v1  ;;  %3213 = vmatprep.subr.bf16.mxu1 %v3423_v1 }
 0x571   : > { %v1978_v33 = vadd.f32 %v2787_v27, %v1977_v31  ;;  %v2030_v34 = vadd.f32 %v2788_v28, %v2029_v32  ;;  %v3157_v35 = vpop.f32.mrb[57].mxu0  ;;  %v3165_v36 = vpop.f32.mrb[57].mxu1 }
 0x572   : > { %v1980_v37 = vpop.f32.mrb[58].mxu0  ;;  %v2032_v38 = vpop.f32.mrb[58].mxu1  ;;  %v2789_v35 = vld [vmem:[%s4036_s2 + $0x16] ss:$0 sm:$0xff] }
 0x573   : > { %v2379_v40 = vpack.c.bf16 %v1978_v33, %v1978_v33  ;;  %v2380_v43 = vpack.c.bf16 %v2030_v34, %v2030_v34  ;;  %v3158_v41 = vpop.f32.mrb[59].mxu0  ;;  %v3166_v44 = vpop.f32.mrb[59].mxu1  ;;  %v2790_v34 = vld [vmem:[%s4036_s2 + $0x17] ss:$0 sm:$0xff] }
 0x575   : > { %v2387_v45 = vsel %vm1177_vm3, %v2379_v40, 0  ;;  %v2433_v46 = vsel %vm1177_vm3, %v2380_v43, 0  ;;  %3198 = vmatmul.mubr.msk.bf16.vlgmr.msra.gmra.mrb[68].mxu0 %vm937_vm2, %v2141_v39  ;;  %3204 = vmatmul.mubr.msk.bf16.vlgmr.msra.gmra.mrb[68].mxu1 %vm937_vm2, %v2142_v42 }
 0x576   : > { %3208 = vmatpush3.bf16.msra.mxu0 %v2387_v45  ;;  %3214 = vmatpush3.bf16.msra.mxu1 %v2433_v46 }
 0x577   : > { %3209 = vmatprep.mubr.msk.bf16.mxu0 %vm3424_vm0, %v3423_v1  ;;  %3215 = vmatprep.mubr.msk.bf16.mxu1 %vm3424_vm0, %v3423_v1 }
 0x578   : > { %v3948_v47 = vpop.f32.mrb[60].mxu0  ;;  %v3950_v48 = vpop.f32.mrb[60].mxu1  ;;  %3219 = vmatprep.subr.bf16.mxu0 %v3423_v1  ;;  %3225 = vmatprep.subr.bf16.mxu1 %v3423_v1 }
 0x579   : > { %v3173_v49 = vpop.f32.mrb[61].mxu0  ;;  %v3181_v50 = vpop.f32.mrb[61].mxu1  ;;  %v2134_v36 = vadd.f32 %v2790_v34, %v3950_v48  ;;  %v2082_v38 = vadd.f32 %v2789_v35, %v3948_v47 }
 0x57a   : > { %v2084_v51 = vpop.f32.mrb[62].mxu0  ;;  %v2136_v52 = vpop.f32.mrb[62].mxu1 }
 0x57b   : > { %v3174_v53 = vpop.f32.mrb[63].mxu0  ;;  %v3182_v54 = vpop.f32.mrb[63].mxu1  ;;  %v2382_v40 = vpack.c.bf16 %v2134_v36, %v2134_v36  ;;  %v2381_v44 = vpack.c.bf16 %v2082_v38, %v2082_v38 }
 0x57d   : > { %v2525_v50 = vsel %vm1177_vm3, %v2382_v40, 0  ;;  %v2479_v48 = vsel %vm1177_vm3, %v2381_v44, 0 }
 0x640   : > { %v2187_v55 = vpop.f32.mrb[64].mxu0  ;;  %v2233_v56 = vpop.f32.mrb[64].mxu1 }
 0x641   : > { %v3187_v57 = vpop.f32.mrb[65].mxu0  ;;  %v3193_v58 = vpop.f32.mrb[65].mxu1  ;;  %v2334_v59 = vsel %vm937_vm2, %v2233_v56, -inf  ;;  %v2331_v60 = vsel %vm937_vm2, %v2187_v55, -inf }
 0x642   : > { %2335 = vmax.xlane.f32.xlu0 %v2334_v59  ;;  %v2236_v61 = vpop.f32.mrb[66].mxu1  ;;  %2332 = vmax.xlane.f32.xlu1 %v2331_v60  ;;  %v2190_v62 = vpop.f32.mrb[66].mxu0 }
 0x643   : > { %v3188_v63 = vpop.f32.mrb[67].mxu0  ;;  %v3194_v0 = vpop.f32.mrb[67].mxu1 }
 0x648   : > { %v2279_v2 = vpop.f32.mrb[68].mxu0  ;;  %v2325_v3 = vpop.f32.mrb[68].mxu1 }
 0x649   : > { %v3199_v4 = vpop.f32.mrb[69].mxu0  ;;  %v3205_v5 = vpop.f32.mrb[69].mxu1  ;;  %v2337_v6 = vsel %vm937_vm2, %v2279_v2, -inf  ;;  %v2340_v11 = vsel %vm937_vm2, %v2325_v3, -inf }
 0x64a   : > { %v2328_v7 = vpop.f32.mrb[70].mxu1  ;;  %2338 = vmax.xlane.f32.xlu0 %v2337_v6  ;;  %v2282_v8 = vpop.f32.mrb[70].mxu0 }
 0x64b   : > { %v3200_v9 = vpop.f32.mrb[71].mxu0  ;;  %v3206_v10 = vpop.f32.mrb[71].mxu1 }
 0x64e   : > { %2341 = vmax.xlane.f32.xlu0 %v2340_v11 }
 0x6cf   : > { %v2336_v12 = vpop.xlane.xlu0 %2335  ;;  %v2333_v13 = vpop.xlane.xlu1 %2332 }
 0x6d0   : > { %v2344_v14 = vsub.f32 %v2233_v56, %v2336_v12  ;;  %v2343_v15 = vsub.f32 %v2187_v55, %v2333_v13 }
 0x6d2   : > { %v2349_v16 = vmul.f32 1.442695, %v2344_v14  ;;  %v2347_v17 = vmul.f32 1.442695, %v2343_v15 }
 0x6d4   : > { %3341 = vpow2.f32 %v2349_v16 }
 0x6d5   : > { %3343 = vpow2.f32 %v2347_v17 }
 0x6d7   : > { %v2339_v18 = vpop.xlane.xlu0 %2338 }
 0x6d8   : > { %v2345_v19 = vsub.f32 %v2279_v2, %v2339_v18 }
 0x6da   : > { %v2351_v20 = vmul.f32 1.442695, %v2345_v19 }
 0x6db   : > { %v2342_v21 = vpop.xlane.xlu0 %2341 }
 0x6dc   : > { %3345 = vpow2.f32 %v2351_v20  ;;  %v2346_v22 = vsub.f32 %v2325_v3, %v2342_v21 }
 0x6de   : > { %v3342_v23 = vpop.eup %3341  ;;  %v2353_v24 = vmul.f32 1.442695, %v2346_v22 }
 0x6df   : > { %v3344_v25 = vpop.eup %3343  ;;  %v2358_v26 = vsel %vm937_vm2, %v3342_v23, 0.0 }
 0x6e0   : > { %3347 = vpow2.f32 %v2353_v24  ;;  %v2355_v27 = vsel %vm937_vm2, %v3344_v25, 0.0  ;;  %2359 = vadd.xlane.f32.xlu0 %v2358_v26 }
 0x6e1   : > { %2356 = vadd.xlane.f32.xlu1 %v2355_v27 }
 0x6e6   : > { %v3346_v28 = vpop.eup %3345 }
 0x6e7   : > { %v2361_v29 = vsel %vm937_vm2, %v3346_v28, 0.0 }
 0x6e8   : > { %2362 = vadd.xlane.f32.xlu1 %v2361_v29 }
 0x6ea   : > { %v3348_v30 = vpop.eup %3347 }
 0x6eb   : > { %v2364_v31 = vsel %vm937_vm2, %v3348_v30, 0.0 }
 0x6ec   : > { %2365 = vadd.xlane.f32.xlu0 %v2364_v31 }
 0x76d   : > { %v2360_v32 = vpop.xlane.xlu0 %2359 }
 0x76e   : > { %v2357_v33 = vpop.xlane.xlu1 %2356  ;;  %3349 = vrcp.f32 %v2360_v32 }
 0x76f   : > { %3351 = vrcp.f32 %v2357_v33 }
 0x775   : > { %v2363_v37 = vpop.xlane.xlu1 %2362 }
 0x776   : > { %3353 = vrcp.f32 %v2363_v37 }
 0x778   : > { %v3350_v39 = vpop.eup %3349 }
 0x779   : > { %v3352_v42 = vpop.eup %3351  ;;  %v2370_v43 = vmul.f32 %v3350_v39, %v3342_v23  ;;  %v2366_v41 = vpop.xlane.xlu0 %2365 }
 0x77a   : > { %v2368_v45 = vmul.f32 %v3352_v42, %v3344_v25  ;;  %3355 = vrcp.f32 %v2366_v41 }
 0x77b   : > { %v2376_v46 = vpack.c.bf16 %v2370_v43, %v2370_v43 }
 0x77c   : > { %v2375_v49 = vpack.c.bf16 %v2368_v45, %v2368_v45 }
 0x77d   : > { %3216 = vmatmul.mubr.msk.bf16.vlgmr.msra.gmra.mrb[72].mxu1 %vm937_vm2, %v2376_v46 }
 0x77e   : > { %3210 = vmatmul.mubr.msk.bf16.vlgmr.msra.gmra.mrb[72].mxu0 %vm937_vm2, %v2375_v49  ;;  %3226 = vmatpush3.bf16.msra.mxu1 %v2525_v50 }
 0x77f   : > { %3220 = vmatpush3.bf16.msra.mxu0 %v2479_v48  ;;  %3221 = vmatprep.mubr.msk.bf16.mxu0 %vm3424_vm0, %v3423_v1 }
 0x780   : > { %v3354_v47 = vpop.eup %3353  ;;  %3227 = vmatprep.mubr.msk.bf16.mxu1 %vm3424_vm0, %v3423_v1 }
 0x781   : > { %v2372_v51 = vmul.f32 %v3354_v47, %v3346_v28 }
 0x783   : > { %v2377_v52 = vpack.c.bf16 %v2372_v51, %v2372_v51 }
 0x784   : > { %v3356_v53 = vpop.eup %3355 }
 0x785   : > { %v2374_v54 = vmul.f32 %v3356_v53, %v3348_v30 }
 0x786   : > { %3222 = vmatmul.mubr.msk.bf16.vlgmr.msra.gmra.mrb[76].mxu0 %vm937_vm2, %v2377_v52 }
 0x787   : > { %v2378_v55 = vpack.c.bf16 %v2374_v54, %v2374_v54 }
 0x789   : > { %3228 = vmatmul.mubr.msk.bf16.vlgmr.msra.gmra.mrb[76].mxu1 %vm937_vm2, %v2378_v55 }
 0x850   : > { %v2469_v56 = vpop.f32.mrb[72].mxu1 }
 0x851   : > { %v2423_v57 = vpop.f32.mrb[72].mxu0  ;;  %2568 = vrot.lane.b32.xlu1 %v2469_v56, %s3425_s29  ;;  %v3217_v58 = vpop.f32.mrb[73].mxu1  ;;  %s159_s29 = sand.u32 1, %s3413_s13  }
 0x852   : > { %v3211_v59 = vpop.f32.mrb[73].mxu0  ;;  %v2472_v60 = vpop.f32.mrb[74].mxu1  ;;  %s2585_s5 = scalar_lea.sflag [#allocation3], %s159_s29 }
 0x853   : > { %v2426_v61 = vpop.f32.mrb[74].mxu0  ;;  %v3218_v62 = vpop.f32.mrb[75].mxu1 }
 0x854   : > { %v3212_v1 = vpop.f32.mrb[75].mxu0 }
 0x859   : > { %v2515_v63 = vpop.f32.mrb[76].mxu0 }
 0x85a   : > { %2572 = vrot.lane.b32.xlu0 %v2515_v63, %s3426_s7  ;;  %v3223_v0 = vpop.f32.mrb[77].mxu0  ;;  %s2661_s7 = sshll.u32 %s159_s29, 3 }
 0x85b   : > { %v2518_v2 = vpop.f32.mrb[78].mxu0  ;;  %s161_s27 = scalar_lea.vmem [#allocation2], %s2661_s7 }
 0x85c   : > { %v3224_v3 = vpop.f32.mrb[79].mxu0  ;;  %v2561_v4 = vpop.f32.mrb[76].mxu1  ;;  %s2598_s28 = sshll.u32 %s161_s27, 4  ;;  %s3993_s28 = int_to_ptr.vmem [resolvable:$true] %s2598_s28 }
 0x85d   : > { %2576 = vrot.lane.b32.xlu1 %v2561_v4, %s3427_s17  ;;  %v3229_v5 = vpop.f32.mrb[77].mxu1  ;;  %s3359_s6 = scalar_lea.vmem %s3993_s28, 128  ;;  %p3366_p0 = scmp.lt.s32.totalorder %s3993_s28, %s3364_s8 }
 0x85e   : > { %v2564_v6 = vpop.f32.mrb[78].mxu1  ;;  %p3360_p11 = scmp.ne.s32.totalorder %s3993_s28, %s3359_s6  ;;  %p3367_p1 = scmp.lt.s32.totalorder %s3365_s9, %s3359_s6 }
 0x85f   : > { %v3230_v7 = vpop.f32.mrb[79].mxu1 }
 0x860   : > { %p3361_p12 = pnand %p3360_p11, %p3487_p5  ;;  %p3368_p2 = por %p3367_p1, %p3366_p0 }
 0x862   : > { %p3362_p13 = pneg %p3361_p12 }
 0x864   : > { %p3369_p3 = pnand %p3368_p2, %p3362_p13 }
 0x8c3   : > { %v2569_v8 = vpop.permute.xlu1 %2568 }
 0x8c4   : > { %v2579_v10 = vsel %vm937_vm2, %v2423_v57, %v2569_v8 }
 0x8cc   : > { %v2573_v9 = vpop.permute.xlu0 %2572 }
 0x8cd   : > { %v2580_v11 = vsel %vm1372_vm4, %v2579_v10, %v2573_v9 }
 0x8cf   : > { %v2577_v12 = vpop.permute.xlu1 %2576 }
 0x8d0   : > { %v2581_v13 = vsel %vm1374_vm5, %v2580_v11, %v2577_v12 }
 0x8d1   : > { %3357 = vtanh.f32 %v2581_v13 }
 0x8db   : > { %v3358_v14 = vpop.eup %3357 }
 0x8dc   : > { %2583 = vst.msk [vmem:[%s161_s27] sm:$0xff] %vm313_vm1, %v3358_v14 }
 0x8dd   : > { %3372 = shalt.err (!%p3369_p3)
}
 0x8de   : > { %s3373_s10 = scalar_lea.hbm %s3991_s4, 128  ;;  %s3377_s20 = scalar_lea.hbm %s4037_s3, 256 }
 0x8df   : > { %p3374_p4 = scmp.ne.s32.totalorder %s3991_s4, %s3373_s10  ;;  %p3378_p9 = scmp.lt.u32.totalorder %s3991_s4, %s4037_s3 }
 0x8e0   : > { %p3379_p10 = scmp.lt.u32.totalorder %s3377_s20, %s3373_s10  ;;  %p3381_p12 = scmp.lt.u32.totalorder %s3373_s10, %s3991_s4 }
 0x8e1   : > { %p3375_p7 = pnand %p3374_p4, %p3487_p5 }
 0x8e2   : > { %p3380_p11 = por %p3379_p10, %p3378_p9 }
 0x8e3   : > { %p3376_p8 = pneg %p3375_p7 }
 0x8e4   : > { %p3382_p13 = por %p3381_p12, %p3380_p11 }
 0x8e6   : > { %p3383_p0 = pnand %p3382_p13, %p3376_p8 }
 0x8e8   : > { %3386 = shalt.err (!%p3383_p0)
}
 0x8e9   : > { %3231 = dma.vmem_to_hbm [thread:$0]  (%p3487_p5), %s3993_s28, 128, %s3991_s4, %s2585_s5  }
 0x8ea PF: > { %p3237_p1 = scmp.ge.s32.totalorder %s3421_s15, 2  ;;  %s2610_s29 = sand.u32 1, %s3409_s12  }
 0x8eb   : > { %s2611_s7 = scalar_lea.sflag [#allocation3], %s2610_s29 }
 0x8ec   : > { %p3234_p2 = pnand %p3237_p1, %p3491_p6 }
 0x8ee   : > { %3404 = dma.done.wait (!%p3234_p2), %s2611_s7, 128  }
 0x8ef   : > { %3406 = vsyncadd (!%p3234_p2), %s2611_s7, 4294967168  ;;  %p13_p3 = scmp.ge.s32.totalorder %s3474_s18, 4   ;;  %s4040_s12 = smov %s3413_s13 }
 0x8f0   : > { %s4041_s13 = smov %s3417_s14  ;;  %s4042_s14 = smov %s3485_s21 }
 0x8f1   : > { %s4043_s15 = smov %s3474_s18  ;;  %15 = sbr.rel (!%p13_p3) target bundleno = 3 (0x3), region = 69 }
 0x8f8   :  { %2616 = vsyncpa [#allocation3], 1 }
 0x8f9   :  { %2618 = vsyncpa [#allocation3 + $0x1], 1 }

</bundles_post_ra>
